<compile_context>
chip_gen: v5e
topology: v5e:2x2
jax: 0.10.0
libtpu: 0.0.40
codegen_flags: <defaults>
</compile_context>

<pallas_src>
import functools

import jax
import jax.numpy as jnp
from jax import lax
from jax.experimental import pallas as pl
from jax.experimental.pallas import tpu as pltpu


_MIB = 1024 * 1024


def _round_up(x, m):
    return -(-x // m) * m


@functools.lru_cache(maxsize=1)
def _tpu_config():
    """Generation-aware (num_tensorcores, vmem_limit_bytes, tile_byte_budget)."""
    kind = ""
    try:
        kind = jax.devices()[0].device_kind.lower()
    except Exception:
        pass
    is_lite = ("lite" in kind) or ("5e" in kind) or ("6e" in kind)
    if ("v7" in kind) or ("7x" in kind):
        # v7x: 64 MiB VMEM per TensorCore, 2 TensorCores per chip.
        return 2, 44 * _MIB, 30 * _MIB
    if ("v6" in kind) or (("v5" in kind) and is_lite):
        # v5e / v6e: 128 MiB VMEM, single TensorCore.
        return 1, 64 * _MIB, 44 * _MIB
    if ("v4" in kind) or ("v5" in kind):
        # v4 / v5p: 128 MiB VMEM, megacore (2 TensorCores).
        return 2, 64 * _MIB, 44 * _MIB
    # Unknown chip: conservative limits that fit every generation.
    return 1, 32 * _MIB, 20 * _MIB


def _choose_ts(S, bytes_per_col, budget, n_cores):
    """Lane-aligned spatial tile: as big as the VMEM budget allows; on 2-TC
    chips re-derived so the chunk count is even and a few steps deep per core."""
    s_ceil = _round_up(max(S, 1), 128)
    cap = max(128, (budget // max(bytes_per_col, 1)) // 128 * 128)
    cap = min(cap, s_ceil)
    if n_cores <= 1:
        return cap
    n_blocks = pl.cdiv(S, cap)
    per_core = pl.cdiv(n_blocks, 2)
    max_per_core = max(1, (s_ceil // 128) // 2)
    per_core = min(max(per_core, 4), max_per_core)
    ts = _round_up(pl.cdiv(S, 2 * per_core), 128)
    return max(128, min(ts, cap))


# ---------------------------------------------------------------------------
# Kernel 1: fp32 spatial sums of x (Rx = B*MK rows) and gt (Rg = B*num_cls
# rows), accumulated directly into the output-resident blocks.  On 2-TC chips
# a leading "parallel" axis of size 2 splits the spatial chunks between the
# TensorCores; partials are combined in the XLA glue.
# ---------------------------------------------------------------------------
def _reduce_kernel(x_ref, g_ref, xs_ref, gs_ref, *, S, ts, n_half, n_cores,
                   n_slots):
    if n_cores == 2:
        core = pl.program_id(0)
        k = pl.program_id(1)
        chunk = core * n_half + k
    else:
        k = pl.program_id(0)
        chunk = k

    @pl.when(k == 0)
    def _():
        xs_ref[...] = jnp.zeros_like(xs_ref)
        gs_ref[...] = jnp.zeros_like(gs_ref)

    def _accumulate(masked):
        xv = x_ref[...].astype(jnp.float32)
        gv = g_ref[...].astype(jnp.float32)
        if masked:
            col = chunk * ts + lax.broadcasted_iota(jnp.int32, (1, ts), 1)
            valid = col < S
            xv = jnp.where(valid, xv, 0.0)
            gv = jnp.where(valid, gv, 0.0)
        # TODO(synk): if v7x bundle dumps show the XLU saturating on this
        # cross-lane reduce, switch to a lane-parallel (R, 128) VPU
        # accumulation with a single final 128->1 reduce per grid step.
        xs_ref[...] += jnp.sum(xv, axis=-1, keepdims=True)
        gs_ref[...] += jnp.sum(gv, axis=-1, keepdims=True)

    if n_slots * ts == S:
        # Every chunk is full and in range: no masking anywhere.
        _accumulate(masked=False)
    else:
        is_edge = (chunk + 1) * ts > S

        @pl.when(jnp.logical_not(is_edge))
        def _():
            _accumulate(masked=False)

        @pl.when(is_edge)
        def _():
            _accumulate(masked=True)


def spatial_sums(x2, g2):
    n_cores, vmem_limit, budget = _tpu_config()
    Rx, S = x2.shape
    Rg, _ = g2.shape
    # Double-buffered input blocks + fp32 upcast / select temporaries.
    bytes_per_col = (2 * (Rx * x2.dtype.itemsize + Rg * g2.dtype.itemsize)
                     + 8 * (Rx + Rg))
    ts = _choose_ts(S, bytes_per_col, budget, n_cores)
    n_blocks = pl.cdiv(S, ts)
    split = (n_cores == 2) and (n_blocks >= 2)

    if split:
        n_half = pl.cdiv(n_blocks, 2)
        n_slots = 2 * n_half
        grid = (2, n_half)
        dims = ("parallel", "arbitrary")
        # Clamp guards the (rare) fully-out-of-range slot when the chunk count
        # is odd; its contribution is masked to zero in the kernel.
        in_map = lambda c, k: (0, jnp.minimum(c * n_half + k, n_blocks - 1))
        out_map = lambda c, k: (c, 0, 0)
    else:
        n_half = n_blocks
        n_slots = n_blocks
        grid = (n_blocks,)
        dims = ("arbitrary",)
        in_map = lambda k: (0, k)
        out_map = lambda k: (0, 0, 0)

    n_out = 2 if split else 1
    kernel = functools.partial(_reduce_kernel, S=S, ts=ts, n_half=n_half,
                               n_cores=2 if split else 1, n_slots=n_slots)
    return pl.pallas_call(
        kernel,
        out_shape=(jax.ShapeDtypeStruct((n_out, Rx, 1), jnp.float32),
                   jax.ShapeDtypeStruct((n_out, Rg, 1), jnp.float32)),
        grid_spec=pltpu.PrefetchScalarGridSpec(
            num_scalar_prefetch=0,
            grid=grid,
            in_specs=[pl.BlockSpec((Rx, ts), in_map),
                      pl.BlockSpec((Rg, ts), in_map)],
            out_specs=[pl.BlockSpec((None, Rx, 1), out_map),
                       pl.BlockSpec((None, Rg, 1), out_map)],
        ),
        compiler_params=pltpu.CompilerParams(
            dimension_semantics=dims,
            vmem_limit_bytes=vmem_limit),
    )(x2, g2)


# ---------------------------------------------------------------------------
# Kernel 2: region = x * weight, one scalar per row (channel), broadcast over
# the spatial (lane) dimension.  Computed and stored in the input dtype.
# Tail of the last block is discarded on writeback.
# ---------------------------------------------------------------------------
def _scale_kernel(x_ref, w_ref, o_ref):
    o_ref[...] = x_ref[...] * w_ref[...].astype(o_ref.dtype)


def scale_features(x2, w_col):
    n_cores, vmem_limit, budget = _tpu_config()
    R, S = x2.shape
    # Double-buffered input + output blocks (+ small temp).
    bytes_per_col = 5 * R * x2.dtype.itemsize
    ts = _choose_ts(S, bytes_per_col, budget, n_cores)
    grid = (pl.cdiv(S, ts),)
    return pl.pallas_call(
        _scale_kernel,
        out_shape=jax.ShapeDtypeStruct((R, S), x2.dtype),
        grid_spec=pltpu.PrefetchScalarGridSpec(
            num_scalar_prefetch=0,
            grid=grid,
            in_specs=[pl.BlockSpec((R, ts), lambda s: (0, s)),
                      pl.BlockSpec((R, 1), lambda s: (0, 0))],
            out_specs=pl.BlockSpec((R, ts), lambda s: (0, s)),
        ),
        compiler_params=pltpu.CompilerParams(
            dimension_semantics=("parallel",),
            vmem_limit_bytes=vmem_limit),
    )(x2, w_col)


# ---------------------------------------------------------------------------
# Tiny glue (plain XLA): means -> per-class feat (B,5) -> 1x1x1-conv MLP
# (5->64->128->64->4, LeakyReLU 0.2) -> sigmoid -> per-output-channel weight.
# ---------------------------------------------------------------------------
def _fuse_weights(xsum, gsum, params, *, B, M, num_cls, S):
    inv_s = jnp.float32(1.0 / S)
    prm_avg = gsum.reshape(B, num_cls) * inv_s + jnp.float32(1e-7)     # (B, C)
    xmean = xsum.reshape(B, M, num_cls) * inv_s                        # (B, M, C)
    feat_avg = xmean / prm_avg[:, None, :]                             # (B, M, C)
    feats = jnp.concatenate(
        [jnp.transpose(feat_avg, (2, 0, 1)),        # (C, B, M)
         prm_avg.T[:, :, None]],                    # (C, B, 1)
        axis=-1)                                    # (C, B, M + 1)

    h = feats
    for layer in (1, 2, 3, 4):
        h = jnp.einsum("cbi,cio->cbo", h, params[f"w{layer}"],
                       preferred_element_type=jnp.float32)
        h = h + params[f"b{layer}"][:, None, :]
        if layer < 4:
            h = jnp.where(h > 0, h, 0.2 * h)        # LeakyReLU(0.2)
    weight = jax.nn.sigmoid(h)                      # (C, B, M)

    # sam_weight_fuse's output channel index is c = m * num_cls + i.
    return jnp.transpose(weight, (1, 2, 0)).reshape(B * M * num_cls, 1)


# ---------------------------------------------------------------------------
# Parameter init: PyTorch Conv3d-default uniform bounds, one stack per class.
# ---------------------------------------------------------------------------
def init_params(key, num_cls=4):
    dims = [(5, 64), (64, 128), (128, 64), (64, 4)]
    params = {}
    for layer, (fin, fout) in enumerate(dims, start=1):
        key, kw, kb = jax.random.split(key, 3)
        bound = 1.0 / (fin ** 0.5)
        params[f"w{layer}"] = jax.random.uniform(
            kw, (num_cls, fin, fout), jnp.float32, -bound, bound)
        params[f"b{layer}"] = jax.random.uniform(
            kb, (num_cls, fout), jnp.float32, -bound, bound)
    return params


# ---------------------------------------------------------------------------
# Full forward pass (mirrors sam_weight_fuse.forward).
# ---------------------------------------------------------------------------
@functools.partial(jax.jit, static_argnames=("num_cls",))
def sam_weight_fuse_forward(x, gt, params, *, num_cls=4):
    B, MK, H, W, Z = x.shape
    if MK != 4 * num_cls:
        raise ValueError("sam_weight_f's conv stack hard-codes 4 channels per class")
    M = MK // num_cls
    S = H * W * Z

    # Free (metadata-only) flatten to lane-dense 2D views; keep native dtype.
    x2 = x.reshape(B * MK, S)
    g2 = gt.reshape(B * num_cls, S)

    # Kernel 1: fp32 spatial sums (per-TensorCore partials combined below).
    xpart, gpart = spatial_sums(x2, g2)
    xsum = xpart.sum(axis=0)[:, 0]                  # (B*MK,)
    gsum = gpart.sum(axis=0)[:, 0]                  # (B*num_cls,)

    # Tiny per-class MLP + sigmoid in plain XLA (a dedicated Pallas kernel at
    # ~1.5 KFLOPs would be pure launch overhead).
    w_col = _fuse_weights(xsum, gsum, params, B=B, M=M, num_cls=num_cls, S=S)

    # Kernel 2: broadcast multiply in the input dtype.
    region = scale_features(x2, w_col)              # (B*MK, S)
    return region.reshape(B, MK, H, W, Z)


# ---------------------------------------------------------------------------
# Pure-JAX reference mirroring the PyTorch forward exactly (for validation).
# ---------------------------------------------------------------------------
def _reference_forward(x, gt, params, *, num_cls):
    B, MK, H, W, Z = x.shape
    M = MK // num_cls
    xr = x.reshape(B, M, num_cls, H, W, Z).transpose(0, 2, 1, 3, 4, 5)  # (B,C,M,...)
    outs = []
    for i in range(num_cls):
        xi = xr[:, i]                                                   # (B,M,H,W,Z)
        prm = gt[:, i]                                                  # (B,H,W,Z)
        prm_avg = jnp.mean(prm.astype(jnp.float32), axis=(1, 2, 3)) + 1e-7
        feat_avg = jnp.mean(xi.astype(jnp.float32), axis=(2, 3, 4)) / prm_avg[:, None]
        feat = jnp.concatenate([feat_avg, prm_avg[:, None]], axis=1)    # (B, 5)
        h = feat
        for layer in (1, 2, 3, 4):
            h = h @ params[f"w{layer}"][i] + params[f"b{layer}"][i]
            if layer < 4:
                h = jnp.where(h > 0, h, 0.2 * h)
        w = jax.nn.sigmoid(h)                                           # (B, M)
        outs.append(xi * w[:, :, None, None, None].astype(xi.dtype))
    out = jnp.stack(outs, axis=1)                                       # (B,C,M,...)
    return out.transpose(0, 2, 1, 3, 4, 5).reshape(B, MK, H, W, Z)


if __name__ == "__main__":
    num_cls = 4
    B, M, H, W, Z = 2, 4, 8, 8, 8
    MK = M * num_cls                                 # 16 input channels

    key = jax.random.PRNGKey(0)
    kx, kg, kp = jax.random.split(key, 3)
    x = jax.random.normal(kx, (B, MK, H, W, Z), dtype=jnp.float32)
    gt = jax.random.uniform(kg, (B, num_cls, H, W, Z), dtype=jnp.float32,
                            minval=0.1, maxval=1.0)
    params = init_params(kp, num_cls=num_cls)

    out = sam_weight_fuse_forward(x, gt, params, num_cls=num_cls)
    out = jax.block_until_ready(out)
    assert out.shape == (B, MK, H, W, Z)
    assert out.dtype == x.dtype

    ref = _reference_forward(x, gt, params, num_cls=num_cls)
    max_err = float(jnp.max(jnp.abs(out - ref)))
    assert max_err < 5e-4, f"mismatch vs reference: {max_err}"
    print("KERNEL_OK")
</pallas_src>

<mosaic_0001>
module attributes {stable_mosaic.version = 11 : i64} {
  func.func @_reduce_kernel(%arg0: i32, %arg1: memref<32x512xf32, #tpu.memory_space<vmem>>, %arg2: memref<8x512xf32, #tpu.memory_space<vmem>>, %arg3: memref<1x32x1xf32, #tpu.memory_space<vmem>>, %arg4: memref<1x8x1xf32, #tpu.memory_space<vmem>>) attributes {dimension_semantics = [#tpu.dimension_semantics<arbitrary>], iteration_bounds = array<i64: 1>, scalar_prefetch = 0 : i64, scratch_operands = 0 : i64, tpu.core_type = #tpu.core_type<tc>, window_params = [{transform_indices = @transform_0, window_bounds = array<i64: 32, 512>}, {transform_indices = @transform_1, window_bounds = array<i64: 8, 512>}, {pipeline_mode = #tpu.pipeline_mode<synchronous>, transform_indices = @transform_2, window_bounds = array<i64: 1, 32, 1>}, {pipeline_mode = #tpu.pipeline_mode<synchronous>, transform_indices = @transform_3, window_bounds = array<i64: 1, 8, 1>}]} {
    %c0_i32 = arith.constant 0 : i32
    %0 = arith.cmpi eq, %arg0, %c0_i32 : i32
    %1 = arith.extui %0 : i1 to i32
    %c0_i32_0 = arith.constant 0 : i32
    %2 = arith.cmpi ne, %1, %c0_i32_0 : i32
    scf.if %2 {
      %cst_17 = arith.constant 0.000000e+00 : f32
      %21 = vector.broadcast %cst_17 : f32 to vector<32x1xf32>
      %c0_18 = arith.constant 0 : index
      %c0_19 = arith.constant 0 : index
      %c0_20 = arith.constant 0 : index
      %22 = vector.load %arg3[%c0_18, %c0_19, %c0_20] : memref<1x32x1xf32, #tpu.memory_space<vmem>>, vector<1x32x1xf32>
      %23 = vector.shape_cast %22 : vector<1x32x1xf32> to vector<32x1xf32>
      %24 = vector.shape_cast %21 : vector<32x1xf32> to vector<1x32x1xf32>
      tpu.vector_store %arg3[%c0_18, %c0_19, %c0_20], %24 {strides = array<i32>} : memref<1x32x1xf32, #tpu.memory_space<vmem>>, vector<1x32x1xf32>,
      %cst_21 = arith.constant 0.000000e+00 : f32
      %25 = vector.broadcast %cst_21 : f32 to vector<8x1xf32>
      %c0_22 = arith.constant 0 : index
      %c0_23 = arith.constant 0 : index
      %c0_24 = arith.constant 0 : index
      %26 = vector.load %arg4[%c0_22, %c0_23, %c0_24] : memref<1x8x1xf32, #tpu.memory_space<vmem>>, vector<1x8x1xf32>
      %27 = vector.shape_cast %26 : vector<1x8x1xf32> to vector<8x1xf32>
      %28 = vector.shape_cast %25 : vector<8x1xf32> to vector<1x8x1xf32>
      tpu.vector_store %arg4[%c0_22, %c0_23, %c0_24], %28 {strides = array<i32>} : memref<1x8x1xf32, #tpu.memory_space<vmem>>, vector<1x8x1xf32>,
    } else {
    }
    %c0 = arith.constant 0 : index
    %c0_1 = arith.constant 0 : index
    %3 = vector.load %arg1[%c0, %c0_1] : memref<32x512xf32, #tpu.memory_space<vmem>>, vector<32x512xf32>
    %c0_2 = arith.constant 0 : index
    %c0_3 = arith.constant 0 : index
    %4 = vector.load %arg2[%c0_2, %c0_3] : memref<8x512xf32, #tpu.memory_space<vmem>>, vector<8x512xf32>
    %c0_4 = arith.constant 0 : index
    %c0_5 = arith.constant 0 : index
    %c0_6 = arith.constant 0 : index
    %5 = vector.load %arg3[%c0_4, %c0_5, %c0_6] : memref<1x32x1xf32, #tpu.memory_space<vmem>>, vector<1x32x1xf32>
    %6 = vector.shape_cast %5 : vector<1x32x1xf32> to vector<32x1xf32>
    %cst = arith.constant dense<0.000000e+00> : vector<32xf32>
    %7 = vector.multi_reduction <add>, %3, %cst [1] : vector<32x512xf32> to vector<32xf32>
    %8 = vector.shape_cast %7 : vector<32xf32> to vector<32x1xf32>
    %9 = arith.addf %6, %8 : vector<32x1xf32>
    %c0_7 = arith.constant 0 : index
    %c0_8 = arith.constant 0 : index
    %c0_9 = arith.constant 0 : index
    %10 = vector.load %arg3[%c0_7, %c0_8, %c0_9] : memref<1x32x1xf32, #tpu.memory_space<vmem>>, vector<1x32x1xf32>
    %11 = vector.shape_cast %10 : vector<1x32x1xf32> to vector<32x1xf32>
    %12 = vector.shape_cast %9 : vector<32x1xf32> to vector<1x32x1xf32>
    tpu.vector_store %arg3[%c0_7, %c0_8, %c0_9], %12 {strides = array<i32>} : memref<1x32x1xf32, #tpu.memory_space<vmem>>, vector<1x32x1xf32>,
    %c0_10 = arith.constant 0 : index
    %c0_11 = arith.constant 0 : index
    %c0_12 = arith.constant 0 : index
    %13 = vector.load %arg4[%c0_10, %c0_11, %c0_12] : memref<1x8x1xf32, #tpu.memory_space<vmem>>, vector<1x8x1xf32>
    %14 = vector.shape_cast %13 : vector<1x8x1xf32> to vector<8x1xf32>
    %cst_13 = arith.constant dense<0.000000e+00> : vector<8xf32>
    %15 = vector.multi_reduction <add>, %4, %cst_13 [1] : vector<8x512xf32> to vector<8xf32>
    %16 = vector.shape_cast %15 : vector<8xf32> to vector<8x1xf32>
    %17 = arith.addf %14, %16 : vector<8x1xf32>
    %c0_14 = arith.constant 0 : index
    %c0_15 = arith.constant 0 : index
    %c0_16 = arith.constant 0 : index
    %18 = vector.load %arg4[%c0_14, %c0_15, %c0_16] : memref<1x8x1xf32, #tpu.memory_space<vmem>>, vector<1x8x1xf32>
    %19 = vector.shape_cast %18 : vector<1x8x1xf32> to vector<8x1xf32>
    %20 = vector.shape_cast %17 : vector<8x1xf32> to vector<1x8x1xf32>
    tpu.vector_store %arg4[%c0_14, %c0_15, %c0_16], %20 {strides = array<i32>} : memref<1x8x1xf32, #tpu.memory_space<vmem>>, vector<1x8x1xf32>,
    return
  }
  func.func @transform_0(%arg0: i32) -> (i32, i32) {
    %c0_i32 = arith.constant 0 : i32
    %c0_i32_0 = arith.constant 0 : i32
    return %c0_i32, %arg0 : i32, i32
  }
  func.func @transform_1(%arg0: i32) -> (i32, i32) {
    %c0_i32 = arith.constant 0 : i32
    %c0_i32_0 = arith.constant 0 : i32
    return %c0_i32, %arg0 : i32, i32
  }
  func.func @transform_2(%arg0: i32) -> (i32, i32, i32) {
    %c0_i32 = arith.constant 0 : i32
    %c0_i32_0 = arith.constant 0 : i32
    %c0_i32_1 = arith.constant 0 : i32
    %c0_i32_2 = arith.constant 0 : i32
    return %c0_i32, %c0_i32_0, %c0_i32_1 : i32, i32, i32
  }
  func.func @transform_3(%arg0: i32) -> (i32, i32, i32) {
    %c0_i32 = arith.constant 0 : i32
    %c0_i32_0 = arith.constant 0 : i32
    %c0_i32_1 = arith.constant 0 : i32
    %c0_i32_2 = arith.constant 0 : i32
    return %c0_i32, %c0_i32_0, %c0_i32_1 : i32, i32, i32
  }
}

module attributes {stable_mosaic.version = 11 : i64} {
  func.func @_scale_kernel(%arg0: i32, %arg1: memref<32x512xf32, #tpu.memory_space<vmem>>, %arg2: memref<32x1xf32, #tpu.memory_space<vmem>>, %arg3: memref<32x512xf32, #tpu.memory_space<vmem>>) attributes {dimension_semantics = [#tpu.dimension_semantics<parallel>], iteration_bounds = array<i64: 1>, scalar_prefetch = 0 : i64, scratch_operands = 0 : i64, tpu.core_type = #tpu.core_type<tc>, window_params = [{transform_indices = @transform_0, window_bounds = array<i64: 32, 512>}, {pipeline_mode = #tpu.pipeline_mode<synchronous>, transform_indices = @transform_1, window_bounds = array<i64: 32, 1>}, {transform_indices = @transform_2, window_bounds = array<i64: 32, 512>}]} {
    %c0 = arith.constant 0 : index
    %c0_0 = arith.constant 0 : index
    %0 = vector.load %arg1[%c0, %c0_0] : memref<32x512xf32, #tpu.memory_space<vmem>>, vector<32x512xf32>
    %c0_1 = arith.constant 0 : index
    %c0_2 = arith.constant 0 : index
    %1 = vector.load %arg2[%c0_1, %c0_2] : memref<32x1xf32, #tpu.memory_space<vmem>>, vector<32x1xf32>
    %2 = vector.broadcast %1 : vector<32x1xf32> to vector<32x512xf32>
    %3 = arith.mulf %0, %2 : vector<32x512xf32>
    %c0_3 = arith.constant 0 : index
    %c0_4 = arith.constant 0 : index
    %4 = vector.load %arg3[%c0_3, %c0_4] : memref<32x512xf32, #tpu.memory_space<vmem>>, vector<32x512xf32>
    tpu.vector_store %arg3[%c0_3, %c0_4], %3 {strides = array<i32>} : memref<32x512xf32, #tpu.memory_space<vmem>>, vector<32x512xf32>,
    return
  }
  func.func @transform_0(%arg0: i32) -> (i32, i32) {
    %c0_i32 = arith.constant 0 : i32
    %c0_i32_0 = arith.constant 0 : i32
    return %c0_i32, %arg0 : i32, i32
  }
  func.func @transform_1(%arg0: i32) -> (i32, i32) {
    %c0_i32 = arith.constant 0 : i32
    %c0_i32_0 = arith.constant 0 : i32
    %c0_i32_1 = arith.constant 0 : i32
    return %c0_i32, %c0_i32_0 : i32, i32
  }
  func.func @transform_2(%arg0: i32) -> (i32, i32) {
    %c0_i32 = arith.constant 0 : i32
    %c0_i32_0 = arith.constant 0 : i32
    return %c0_i32, %arg0 : i32, i32
  }
}

</mosaic_0001>

<bundles_post_ra>
// kernel: sam_weight_fuse_forward.2
= control target key start
LH: loop header
LB: loop body
LE: loop exit
PB: predicated region body
PF: predicated region fallthrough
CT: control target
= control target key end

     0   :  { %vm17_vm0 = vcmask 7168   ;;  %v93_v3 = vmov 0.0   ;;  %s229_s0 = inlined_call_operand.vmem [shape: f32[32,512], index: 0, kind: input, shape index: {}]   ;;  %s230_s1 = inlined_call_operand.vmem [shape: f32[8,512], index: 1, kind: input, shape index: {}]   ;;  %s231_s2 = inlined_call_operand.vmem [shape: f32[1,32,1], index: 2, kind: output, shape index: {0}]   ;;  %s232_s3 = inlined_call_operand.vmem [shape: f32[1,8,1], index: 3, kind: output, shape index: {1}]  }
   0x1   :  { %v31_v0 = vld [vmem:[%s229_s0 + $0x40] sm:$0xff]  ;;  %v32_v1 = vld [vmem:[%s229_s0 + $0x48] sm:$0xff]  ;;  %v33_v2 = vld [vmem:[%s229_s0 + $0x50] sm:$0xff]  ;;  %20 = vst.msk [vmem:[%s231_s2 + $0x10] sm:$0xff] %vm17_vm0, %v93_v3 }
   0x2   :  { %v57_v4 = vadd.f32 %v32_v1, %v31_v0  ;;  %v23_v5 = vld [vmem:[%s229_s0] sm:$0xff]  ;;  %v24_v6 = vld [vmem:[%s229_s0 + $0x8] sm:$0xff]  ;;  %18 = vst.msk [vmem:[%s231_s2] sm:$0xff] %vm17_vm0, %v93_v3  ;;  %v34_v7 = vld [vmem:[%s229_s0 + $0x58] sm:$0xff] }
   0x3   :  { %v25_v8 = vld [vmem:[%s229_s0 + $0x10] sm:$0xff]  ;;  %v47_v9 = vadd.f32 %v24_v6, %v23_v5  ;;  %v39_v10 = vld [vmem:[%s230_s1] sm:$0xff]  ;;  %19 = vst.msk [vmem:[%s231_s2 + $0x8] sm:$0xff] %vm17_vm0, %v93_v3  ;;  %v26_v12 = vld [vmem:[%s229_s0 + $0x18] sm:$0xff] }
   0x4   :  { %v58_v11 = vadd.f32 %v57_v4, %v33_v2  ;;  %v40_v13 = vld [vmem:[%s230_s1 + $0x8] sm:$0xff]  ;;  %v41_v14 = vld [vmem:[%s230_s1 + $0x10] sm:$0xff]  ;;  %21 = vst.msk [vmem:[%s231_s2 + $0x18] sm:$0xff] %vm17_vm0, %v93_v3  ;;  %v35_v17 = vld [vmem:[%s229_s0 + $0x60] sm:$0xff] }
   0x5   :  { %v48_v15 = vadd.f32 %v47_v9, %v25_v8  ;;  %v77_v16 = vadd.f32 %v40_v13, %v39_v10  ;;  %v36_v18 = vld [vmem:[%s229_s0 + $0x68] sm:$0xff]  ;;  %v37_v19 = vld [vmem:[%s229_s0 + $0x70] sm:$0xff]  ;;  %22 = vst.msk [vmem:[%s232_s3] sm:$0xff] %vm17_vm0, %v93_v3  ;;  %v42_v21 = vld [vmem:[%s230_s1 + $0x18] sm:$0xff] }
   0x6   :  { %v59_v20 = vadd.f32 %v58_v11, %v34_v7  ;;  %v62_v22 = vadd.f32 %v36_v18, %v35_v17  ;;  %v27_v23 = vld [vmem:[%s229_s0 + $0x20] sm:$0xff]  ;;  %v28_v24 = vld [vmem:[%s229_s0 + $0x28] sm:$0xff]  ;;  %v29_v27 = vld [vmem:[%s229_s0 + $0x30] sm:$0xff] }
   0x7   :  { %v49_v25 = vadd.f32 %v48_v15, %v26_v12  ;;  %v78_v26 = vadd.f32 %v77_v16, %v41_v14  ;;  %v52_v28 = vadd.f32 %v28_v24, %v27_v23  ;;  %v38_v31 = vld [vmem:[%s229_s0 + $0x78] sm:$0xff] }
   0x8   :  { %60 = vadd.xlane.f32.xlu1 %v59_v20  ;;  %v63_v29 = vadd.f32 %v62_v22, %v37_v19  ;;  %v30_v33 = vld [vmem:[%s229_s0 + $0x38] sm:$0xff]  ;;  %v45_v36 = vld [vmem:[%s231_s2 + $0x10] sm:$0xff] }
   0x9   :  { %50 = vadd.xlane.f32.xlu0 %v49_v25  ;;  %v79_v30 = vadd.f32 %v78_v26, %v42_v21  ;;  %v53_v32 = vadd.f32 %v52_v28, %v29_v27  ;;  %v43_v37 = vld [vmem:[%s231_s2] sm:$0xff] }
   0xa   :  { %v64_v34 = vadd.f32 %v63_v29, %v38_v31  ;;  %v44_v46 = vld [vmem:[%s231_s2 + $0x8] sm:$0xff] }
   0xb   :  { %80 = vadd.xlane.f32.xlu2 %v79_v30  ;;  %v54_v35 = vadd.f32 %v53_v32, %v30_v33  ;;  %v46_v45 = vld [vmem:[%s231_s2 + $0x18] sm:$0xff] }
   0xc   :  { %v76_v41 = vld [vmem:[%s232_s3] sm:$0xff] }
  0x10   :  { %65 = vadd.xlane.f32.xlu1 %v64_v34 }
  0x11   :  { %55 = vadd.xlane.f32.xlu0 %v54_v35 }
  0x7b   :  { %v61_v38 = vpop.xlane.xlu1 %60 }
  0x7c   :  { %v69_v39 = vadd.f32 %v61_v38, %v45_v36  ;;  %v51_v40 = vpop.xlane.xlu0 %50 }
  0x7d   :  { %v67_v42 = vadd.f32 %v51_v40, %v43_v37 }
  0x7e   :  { %74 = vst.msk [vmem:[%s231_s2 + $0x10] sm:$0xff] %vm17_vm0, %v69_v39  ;;  %v81_v43 = vpop.xlane.xlu2 %80 }
  0x7f   :  { %72 = vst.msk [vmem:[%s231_s2] sm:$0xff] %vm17_vm0, %v67_v42  ;;  %v82_v44 = vadd.f32 %v81_v43, %v76_v41 }
  0x81   :  { %83 = vst.msk [vmem:[%s232_s3] sm:$0xff] %vm17_vm0, %v82_v44 }
  0x83   :  { %v66_v47 = vpop.xlane.xlu1 %65 }
  0x84   :  { %v70_v48 = vadd.f32 %v66_v47, %v46_v45  ;;  %v56_v49 = vpop.xlane.xlu0 %55 }
  0x85   :  { %v68_v50 = vadd.f32 %v56_v49, %v44_v46 }
  0x86   :  { %75 = vst.msk [vmem:[%s231_s2 + $0x18] sm:$0xff] %vm17_vm0, %v70_v48 }
  0x87   :  { %73 = vst.msk [vmem:[%s231_s2 + $0x8] sm:$0xff] %vm17_vm0, %v68_v50 }

// kernel: sam_weight_fuse_forward.3
= control target key start
LH: loop header
LB: loop body
LE: loop exit
PB: predicated region body
PF: predicated region fallthrough
CT: control target
= control target key end

     0   :  { %v90_v0 = vmov 0   ;;  %s214_s1 = inlined_call_operand.vmem [shape: f32[32,1], index: 1, kind: input, shape index: {}]   ;;  %s215_s0 = inlined_call_operand.vmem [shape: f32[32,512], index: 0, kind: input, shape index: {}]   ;;  %s216_s2 = inlined_call_operand.vmem [shape: f32[32,512], index: 2, kind: output, shape index: {}]  }
   0x1   :  { %89 = vset.pattern.permute.xlu1 %v90_v0  ;;  %88 = vset.pattern.permute.xlu0 %v90_v0  ;;  %v29_v1 = vld [vmem:[%s214_s1 + $0x10] sm:$0xff]  ;;  %v27_v2 = vld [vmem:[%s214_s1] sm:$0xff]  ;;  %v30_v3 = vld [vmem:[%s214_s1 + $0x18] sm:$0xff] }
   0x2   :  { %43 = vperm.xlu1 %89, %v29_v1   ;;  %33 = vperm.xlu0 %88, %v27_v2   ;;  %v28_v4 = vld [vmem:[%s214_s1 + $0x8] sm:$0xff]  ;;  %v19_v5 = vld [vmem:[%s215_s0 + $0x40] sm:$0xff]  ;;  %v21_v7 = vld [vmem:[%s215_s0 + $0x50] sm:$0xff] }
   0x3   :  { %v20_v6 = vld [vmem:[%s215_s0 + $0x48] sm:$0xff]  ;;  %v22_v8 = vld [vmem:[%s215_s0 + $0x58] sm:$0xff]  ;;  %v11_v11 = vld [vmem:[%s215_s0] sm:$0xff] }
   0x4   :  { %v12_v15 = vld [vmem:[%s215_s0 + $0x8] sm:$0xff]  ;;  %v13_v17 = vld [vmem:[%s215_s0 + $0x10] sm:$0xff]  ;;  %v14_v18 = vld [vmem:[%s215_s0 + $0x18] sm:$0xff] }
   0x5   :  { %v23_v23 = vld [vmem:[%s215_s0 + $0x60] sm:$0xff]  ;;  %v24_v24 = vld [vmem:[%s215_s0 + $0x68] sm:$0xff]  ;;  %v25_v25 = vld [vmem:[%s215_s0 + $0x70] sm:$0xff] }
   0x6   :  { %v26_v26 = vld [vmem:[%s215_s0 + $0x78] sm:$0xff]  ;;  %v15_v29 = vld [vmem:[%s215_s0 + $0x20] sm:$0xff]  ;;  %v16_v33 = vld [vmem:[%s215_s0 + $0x28] sm:$0xff] }
   0x7   :  { %v17_v35 = vld [vmem:[%s215_s0 + $0x30] sm:$0xff]  ;;  %v18_v36 = vld [vmem:[%s215_s0 + $0x38] sm:$0xff] }
   0xa   :  { %48 = vperm.xlu1 %89, %v30_v3   ;;  %38 = vperm.xlu0 %88, %v28_v4  }
  0x74   :  { %v44_v9 = vpop.permute.xlu1 %43  ;;  %v34_v10 = vpop.permute.xlu0 %33 }
  0x75   :  { %v59_v12 = vmul.f32 %v44_v9, %v19_v5  ;;  %v60_v13 = vmul.f32 %v44_v9, %v20_v6  ;;  %v61_v14 = vmul.f32 %v44_v9, %v21_v7  ;;  %v62_v16 = vmul.f32 %v44_v9, %v22_v8 }
  0x76   :  { %v51_v19 = vmul.f32 %v34_v10, %v11_v11  ;;  %v52_v20 = vmul.f32 %v34_v10, %v12_v15  ;;  %v53_v21 = vmul.f32 %v34_v10, %v13_v17  ;;  %v54_v22 = vmul.f32 %v34_v10, %v14_v18 }
  0x77   :  { %75 = vst [vmem:[%s216_s2 + $0x40] sm:$0xff] %v59_v12 }
  0x78   :  { %76 = vst [vmem:[%s216_s2 + $0x48] sm:$0xff] %v60_v13 }
  0x79   :  { %77 = vst [vmem:[%s216_s2 + $0x50] sm:$0xff] %v61_v14 }
  0x7a   :  { %78 = vst [vmem:[%s216_s2 + $0x58] sm:$0xff] %v62_v16 }
  0x7b   :  { %67 = vst [vmem:[%s216_s2] sm:$0xff] %v51_v19 }
  0x7c   :  { %68 = vst [vmem:[%s216_s2 + $0x8] sm:$0xff] %v52_v20  ;;  %v49_v27 = vpop.permute.xlu1 %48  ;;  %v39_v28 = vpop.permute.xlu0 %38 }
  0x7d   :  { %69 = vst [vmem:[%s216_s2 + $0x10] sm:$0xff] %v53_v21  ;;  %v63_v30 = vmul.f32 %v49_v27, %v23_v23  ;;  %v64_v31 = vmul.f32 %v49_v27, %v24_v24  ;;  %v65_v32 = vmul.f32 %v49_v27, %v25_v25  ;;  %v66_v34 = vmul.f32 %v49_v27, %v26_v26 }
  0x7e   :  { %70 = vst [vmem:[%s216_s2 + $0x18] sm:$0xff] %v54_v22  ;;  %v55_v37 = vmul.f32 %v39_v28, %v15_v29  ;;  %v56_v38 = vmul.f32 %v39_v28, %v16_v33  ;;  %v57_v39 = vmul.f32 %v39_v28, %v17_v35  ;;  %v58_v40 = vmul.f32 %v39_v28, %v18_v36 }
  0x7f   :  { %79 = vst [vmem:[%s216_s2 + $0x60] sm:$0xff] %v63_v30 }
  0x80   :  { %80 = vst [vmem:[%s216_s2 + $0x68] sm:$0xff] %v64_v31 }
  0x81   :  { %81 = vst [vmem:[%s216_s2 + $0x70] sm:$0xff] %v65_v32 }
  0x82   :  { %82 = vst [vmem:[%s216_s2 + $0x78] sm:$0xff] %v66_v34 }
  0x83   :  { %71 = vst [vmem:[%s216_s2 + $0x20] sm:$0xff] %v55_v37 }
  0x84   :  { %72 = vst [vmem:[%s216_s2 + $0x28] sm:$0xff] %v56_v38 }
  0x85   :  { %73 = vst [vmem:[%s216_s2 + $0x30] sm:$0xff] %v57_v39 }
  0x86   :  { %74 = vst [vmem:[%s216_s2 + $0x38] sm:$0xff] %v58_v40 }

</bundles_post_ra>
